<compile_context>
chip_gen: v7x
topology: tpu7x:2x2x1
jax: 0.10.0
libtpu: 0.0.40
codegen_flags: <defaults>
</compile_context>

<pallas_src>
import jax
import jax.numpy as jnp
from jax import lax
from jax.experimental import pallas as pl
from jax.experimental.pallas import tpu as pltpu

_LANE = 128
_SUBLANE = 8
_MAX_TILE = 1024


def _round_up(n, m):
    return ((n + m - 1) // m) * m


def _buffered_supported():
    """Feature-test pl.Buffered / BlockSpec(pipeline_mode=...) once, at import."""
    if not hasattr(pl, "Buffered"):
        return False
    try:
        pl.BlockSpec((_SUBLANE, _LANE), lambda i: (0, 0),
                     pipeline_mode=pl.Buffered(1))
    except TypeError:
        return False
    return True


_BUFFERED_OK = _buffered_supported()


def _hw_info():
    """Best-effort (vmem_capacity_bytes, tensorcores_per_chip)."""
    kind = ""
    try:
        kind = jax.devices()[0].device_kind.lower()
    except Exception:
        kind = ""
    if "v7" in kind:
        vmem_cap, num_tc = 64 * 1024 * 1024, 2      # v7x: 64 MiB / TC, 2 TCs
    else:
        vmem_cap, num_tc = 128 * 1024 * 1024, 1     # v5e / v6e: 128 MiB, 1 TC
    try:
        info = pltpu.get_tpu_info()
        cap = getattr(info, "vmem_capacity_bytes", None)
        if cap:
            vmem_cap = int(cap)
    except Exception:
        pass
    return vmem_cap, num_tc


def _mlp_kernel(x_ref, w1_ref, b1_ref, w2_ref, b2_ref, w3_ref, o_ref):
    """One batch tile: (TB, Dp) -> (1, TB) sigmoid probabilities."""
    x = x_ref[...]                                                      # (TB, Dp)

    # layer[0]: Linear(D, H) + bias, layer[1]: ReLU  (MXU, f32 accumulation)
    h1 = jnp.dot(x, w1_ref[...], preferred_element_type=jnp.float32)   # (TB, Hp)
    h1 = jnp.maximum(h1 + b1_ref[...], 0.0).astype(x.dtype)

    # layer[2]: Linear(H, H) + bias, layer[3]: ReLU
    h2 = jnp.dot(h1, w2_ref[...], preferred_element_type=jnp.float32)  # (TB, Hp)
    h2 = jnp.maximum(h2 + b2_ref[...], 0.0).astype(x.dtype)

    # last_fc: Linear(H, 1), no bias, computed as a transposed contraction
    # (1, Hp) . (TB, Hp) over H -> (1, TB): lane-dense result, no N=1 matmul.
    logits = lax.dot_general(
        w3_ref[...], h2,
        dimension_numbers=(((1,), (1,)), ((), ())),
        preferred_element_type=jnp.float32)                             # (1, TB)

    # Sigmoid epilogue: exp on the EUP, approximate reciprocal also on the EUP.
    o_ref[...] = pl.reciprocal(1.0 + jnp.exp(-logits), approx=True)


def _vmem_estimate(tb, Dp, Hp, *, x_bufs, w_bufs, itemsize):
    x_bytes = x_bufs * tb * Dp * itemsize
    w_bytes = w_bufs * ((Dp * Hp + Hp * Hp + Hp) * itemsize + 2 * Hp * 4)
    out_bytes = 2 * tb * 4
    tmp_bytes = 3 * tb * Hp * 4            # h1 / h2 f32 temporaries + slack
    return x_bytes + w_bytes + out_bytes + tmp_bytes


def _choose_batch_tile(B, Dp, Hp, num_tc, vmem_budget, itemsize):
    def fits(tb):
        return _vmem_estimate(tb, Dp, Hp, x_bufs=2, w_bufs=2,
                              itemsize=itemsize) <= vmem_budget

    # Multi-step only when the batch exceeds the max tile, or on multi-TC
    # parts (v7x) where splitting the batch buys the 2x TensorCore speedup.
    multi = B > _MAX_TILE or (num_tc >= 2 and B >= 2 * _LANE)
    if not multi:
        tb = _round_up(B, _SUBLANE)
        while tb > _SUBLANE and not fits(tb):
            tb = _round_up(max(tb // 2, _SUBLANE), _SUBLANE)
        return tb

    # Multi-step tiles must satisfy the lane rule: multiples of 128.
    max_tb = _MAX_TILE
    while max_tb > _LANE and not fits(max_tb):
        max_tb //= 2
    candidates = list(range(max_tb, _LANE - 1, -_LANE))
    if num_tc >= 2:
        # Prefer the biggest tile giving an even number of steps so the two
        # TensorCores get balanced work.
        for t in candidates:
            steps = pl.cdiv(B, t)
            if steps >= 2 and steps % num_tc == 0:
                return t
    return candidates[0]


def _build_forward(Bp, Dp, Hp, tb, vmem_limit_bytes, weight_mode, x_mode):
    grid = (Bp // tb,)

    def spec(shape, index_map, mode):
        if mode is None:
            return pl.BlockSpec(shape, index_map)
        return pl.BlockSpec(shape, index_map, pipeline_mode=mode)

    w_map = lambda i: (0, 0)
    return pl.pallas_call(
        _mlp_kernel,
        out_shape=jax.ShapeDtypeStruct((1, Bp), jnp.float32),
        grid=grid,
        in_specs=[
            spec((tb, Dp), lambda i: (i, 0), x_mode),   # x tile over batch
            spec((Dp, Hp), w_map, weight_mode),         # W1^T (grid-invariant)
            spec((1, Hp), w_map, weight_mode),          # b1
            spec((Hp, Hp), w_map, weight_mode),         # W2^T
            spec((1, Hp), w_map, weight_mode),          # b2
            spec((1, Hp), w_map, weight_mode),          # w3 row
        ],
        out_specs=pl.BlockSpec((1, tb), lambda i: (0, i)),  # lane-dense store
        compiler_params=pltpu.CompilerParams(
            dimension_semantics=("parallel",),
            vmem_limit_bytes=vmem_limit_bytes,
        ),
    )


def _pad2(a, rows, cols, dtype):
    a = jnp.asarray(a, dtype)
    pr, pc = rows - a.shape[0], cols - a.shape[1]
    if pr or pc:
        a = jnp.pad(a, ((0, pr), (0, pc)))
    return a


def mlp_classifier_forward(x, w1, b1, w2, b2, w3, *, batch_tile=None,
                           compute_dtype=jnp.bfloat16):
    """x: (B, D). Weights in PyTorch (out, in) convention; biases (out,)."""
    B, D = x.shape
    H = w1.shape[0]

    # Pad feature dims to 128 lanes. Zero-padding is mathematically exact for
    # this MLP (padded H columns get zero bias, so ReLU keeps them at zero).
    Dp = _round_up(D, _LANE)
    Hp = _round_up(H, _LANE)

    cd = jnp.dtype(compute_dtype)
    isz = cd.itemsize

    vmem_cap, num_tc = _hw_info()
    vmem_budget = max(int(0.85 * vmem_cap), 32 * 1024 * 1024)

    # Resident-weight feasibility: W1^T + W2^T + w3 + biases must fit in VMEM.
    w_bytes = (Dp * Hp + Hp * Hp + Hp) * isz + 2 * Hp * 4
    if w_bytes + _SUBLANE * Dp * isz > vmem_budget:
        # TODO(synk): tile the H dimension with an extra "arbitrary" reduction
        # grid axis when the resident-weight design exceeds VMEM (Hp >~ 4k on
        # v7x); not needed at the sizes this classifier is used with.
        raise ValueError(
            f"Resident weights ({w_bytes / 2**20:.1f} MiB) exceed the VMEM "
            f"budget ({vmem_budget / 2**20:.1f} MiB); H-tiled fallback not "
            "implemented.")

    # Batch tile: big single-step tiles on 1-TC parts (v5e/v6e); even multi-
    # step grids on v7x so the batch axis shards across both TensorCores.
    if batch_tile is None:
        tb = _choose_batch_tile(B, Dp, Hp, num_tc, vmem_budget, isz)
    else:
        tb = _round_up(batch_tile, _SUBLANE)
        if _round_up(B, tb) > tb:              # multi-step -> lane-rule tiles
            tb = _round_up(tb, _LANE)
    Bp = _round_up(B, tb)
    num_steps = Bp // tb

    # Pipelining modes: single-buffer the grid-invariant weights (halves their
    # VMEM footprint); deepen the x pipeline to 3 buffers when the grid has
    # enough steps for extra overlap to matter and VMEM allows.
    weight_mode = pl.Buffered(1) if _BUFFERED_OK else None
    w_bufs = 1 if weight_mode is not None else 2
    x_mode = None
    x_bufs = 2
    if _BUFFERED_OK and num_steps >= 3 and _vmem_estimate(
            tb, Dp, Hp, x_bufs=3, w_bufs=w_bufs, itemsize=isz) <= vmem_budget:
        x_mode = pl.Buffered(3)
        x_bufs = 3

    est = _vmem_estimate(tb, Dp, Hp, x_bufs=x_bufs, w_bufs=w_bufs, itemsize=isz)
    vmem_limit = min(max(int(1.5 * est), 32 * 1024 * 1024), vmem_budget)

    # Prepare operands: bf16 activations / weights (MXU-native), f32 biases,
    # weights transposed to (in, out) so the kernel does plain x @ W.
    x_p = _pad2(x, Bp, Dp, cd)
    w1_t = _pad2(jnp.asarray(w1).T, Dp, Hp, cd)               # (Dp, Hp)
    w2_t = _pad2(jnp.asarray(w2).T, Hp, Hp, cd)               # (Hp, Hp)
    w3_r = _pad2(jnp.asarray(w3).reshape(1, H), 1, Hp, cd)    # (1, Hp) row
    b1_r = _pad2(jnp.asarray(b1).reshape(1, H), 1, Hp, jnp.float32)
    b2_r = _pad2(jnp.asarray(b2).reshape(1, H), 1, Hp, jnp.float32)

    out = _build_forward(Bp, Dp, Hp, tb, vmem_limit, weight_mode, x_mode)(
        x_p, w1_t, b1_r, w2_t, b2_r, w3_r)

    # torch .squeeze(): (1, Bp) -> (Bp,) -> drop batch padding -> (B,)
    return out.reshape(Bp)[:B]


def reference_forward(x, w1, b1, w2, b2, w3):
    h1 = jnp.maximum(x @ w1.T + b1, 0.0)
    h2 = jnp.maximum(h1 @ w2.T + b2, 0.0)
    return jax.nn.sigmoid(h2 @ w3.T).reshape(-1)


def _make_params(key, B, D, H):
    kx, k1, kb1, k2, kb2, k3 = jax.random.split(key, 6)
    x = jax.random.normal(kx, (B, D), dtype=jnp.float32)
    # PyTorch Linear weight convention: (out_features, in_features)
    w1 = 0.1 * jax.random.normal(k1, (H, D), dtype=jnp.float32)
    b1 = 0.1 * jax.random.normal(kb1, (H,), dtype=jnp.float32)
    w2 = 0.1 * jax.random.normal(k2, (H, H), dtype=jnp.float32)
    b2 = 0.1 * jax.random.normal(kb2, (H,), dtype=jnp.float32)
    w3 = 0.1 * jax.random.normal(k3, (1, H), dtype=jnp.float32)
    return x, w1, b1, w2, b2, w3


if __name__ == "__main__":
    key = jax.random.PRNGKey(0)
    k_a, k_b = jax.random.split(key)

    # Case 1: lane-aligned shapes (input_dim=128, factor=1 -> H=128, B=256).
    # Single big tile on v5e/v6e; two balanced 128-row tiles on v7x.
    B, D = 256, 128
    x, w1, b1, w2, b2, w3 = _make_params(k_a, B, D, D)
    y = jax.block_until_ready(mlp_classifier_forward(x, w1, b1, w2, b2, w3))
    y_ref = reference_forward(x, w1, b1, w2, b2, w3)
    assert y.shape == (B,)
    assert jnp.max(jnp.abs(y - y_ref)) < 2e-2  # bf16 compute tolerance

    # Case 2: small, unaligned shapes (input_dim=32, factor=1, batch=8) --
    # exercises the zero-padding path.
    B2, D2 = 8, 32
    x2, w1b, b1b, w2b, b2b, w3b = _make_params(k_b, B2, D2, D2)
    y2 = jax.block_until_ready(
        mlp_classifier_forward(x2, w1b, b1b, w2b, b2b, w3b))
    y2_ref = reference_forward(x2, w1b, b1b, w2b, b2b, w3b)
    assert y2.shape == (B2,)
    assert jnp.max(jnp.abs(y2 - y2_ref)) < 2e-2

    print("KERNEL_OK")
</pallas_src>

<mosaic_0001>
module attributes {stable_mosaic.version = 11 : i64} {
  func.func @_mlp_kernel(%arg0: i32, %arg1: memref<256x128xbf16, #tpu.memory_space<vmem>>, %arg2: memref<128x128xbf16, #tpu.memory_space<vmem>>, %arg3: memref<1x128xf32, #tpu.memory_space<vmem>>, %arg4: memref<128x128xbf16, #tpu.memory_space<vmem>>, %arg5: memref<1x128xf32, #tpu.memory_space<vmem>>, %arg6: memref<1x128xbf16, #tpu.memory_space<vmem>>, %arg7: memref<1x256xf32, #tpu.memory_space<vmem>>) attributes {dimension_semantics = [#tpu.dimension_semantics<parallel>], iteration_bounds = array<i64: 1>, scalar_prefetch = 0 : i64, scratch_operands = 0 : i64, tpu.core_type = #tpu.core_type<tc>, window_params = [{transform_indices = @transform_0, window_bounds = array<i64: 256, 128>}, {pipeline_mode = #tpu.pipeline_mode<synchronous>, transform_indices = @transform_1, window_bounds = array<i64: 128, 128>}, {pipeline_mode = #tpu.pipeline_mode<synchronous>, transform_indices = @transform_2, window_bounds = array<i64: 1, 128>}, {pipeline_mode = #tpu.pipeline_mode<synchronous>, transform_indices = @transform_3, window_bounds = array<i64: 128, 128>}, {pipeline_mode = #tpu.pipeline_mode<synchronous>, transform_indices = @transform_4, window_bounds = array<i64: 1, 128>}, {pipeline_mode = #tpu.pipeline_mode<synchronous>, transform_indices = @transform_5, window_bounds = array<i64: 1, 128>}, {transform_indices = @transform_6, window_bounds = array<i64: 1, 256>}]} {
    %c0 = arith.constant 0 : index
    %c0_0 = arith.constant 0 : index
    %0 = vector.load %arg1[%c0, %c0_0] : memref<256x128xbf16, #tpu.memory_space<vmem>>, vector<256x128xbf16>
    %c0_1 = arith.constant 0 : index
    %c0_2 = arith.constant 0 : index
    %1 = vector.load %arg2[%c0_1, %c0_2] : memref<128x128xbf16, #tpu.memory_space<vmem>>, vector<128x128xbf16>
    %cst = arith.constant dense<0.000000e+00> : vector<256x128xf32>
    %2 = tpu.matmul %0, %1, %cst {dimension_numbers = #tpu.dot_dimension_numbers<[1], [0], [0], [1], [0, 0, 1, 1], [], []>} : vector<256x128xbf16>, vector<128x128xbf16>, vector<256x128xf32> -> vector<256x128xf32>
    %c0_3 = arith.constant 0 : index
    %c0_4 = arith.constant 0 : index
    %3 = vector.load %arg3[%c0_3, %c0_4] : memref<1x128xf32, #tpu.memory_space<vmem>>, vector<1x128xf32>
    %4 = vector.broadcast %3 : vector<1x128xf32> to vector<256x128xf32>
    %5 = arith.addf %2, %4 : vector<256x128xf32>
    %cst_5 = arith.constant 0.000000e+00 : f32
    %6 = vector.broadcast %cst_5 : f32 to vector<256x128xf32>
    %7 = arith.maximumf %5, %6 : vector<256x128xf32>
    %8 = arith.truncf %7 : vector<256x128xf32> to vector<256x128xbf16>
    %c0_6 = arith.constant 0 : index
    %c0_7 = arith.constant 0 : index
    %9 = vector.load %arg4[%c0_6, %c0_7] : memref<128x128xbf16, #tpu.memory_space<vmem>>, vector<128x128xbf16>
    %cst_8 = arith.constant dense<0.000000e+00> : vector<256x128xf32>
    %10 = tpu.matmul %8, %9, %cst_8 {dimension_numbers = #tpu.dot_dimension_numbers<[1], [0], [0], [1], [0, 0, 1, 1], [], []>} : vector<256x128xbf16>, vector<128x128xbf16>, vector<256x128xf32> -> vector<256x128xf32>
    %c0_9 = arith.constant 0 : index
    %c0_10 = arith.constant 0 : index
    %11 = vector.load %arg5[%c0_9, %c0_10] : memref<1x128xf32, #tpu.memory_space<vmem>>, vector<1x128xf32>
    %12 = vector.broadcast %11 : vector<1x128xf32> to vector<256x128xf32>
    %13 = arith.addf %10, %12 : vector<256x128xf32>
    %cst_11 = arith.constant 0.000000e+00 : f32
    %14 = vector.broadcast %cst_11 : f32 to vector<256x128xf32>
    %15 = arith.maximumf %13, %14 : vector<256x128xf32>
    %16 = arith.truncf %15 : vector<256x128xf32> to vector<256x128xbf16>
    %c0_12 = arith.constant 0 : index
    %c0_13 = arith.constant 0 : index
    %17 = vector.load %arg6[%c0_12, %c0_13] : memref<1x128xbf16, #tpu.memory_space<vmem>>, vector<1x128xbf16>
    %cst_14 = arith.constant dense<0.000000e+00> : vector<1x256xf32>
    %18 = tpu.matmul %17, %16, %cst_14 {dimension_numbers = #tpu.dot_dimension_numbers<[1], [1], [0], [0], [0, 0, 1, 0], [], []>} : vector<1x128xbf16>, vector<256x128xbf16>, vector<1x256xf32> -> vector<1x256xf32>
    %cst_15 = arith.constant 0.000000e+00 : f32
    %19 = vector.broadcast %cst_15 : f32 to vector<1x256xf32>
    %20 = arith.subf %19, %18 : vector<1x256xf32>
    %21 = math.exp %20 : vector<1x256xf32>
    %cst_16 = arith.constant 1.000000e+00 : f32
    %22 = vector.broadcast %cst_16 : f32 to vector<1x256xf32>
    %23 = arith.addf %22, %21 : vector<1x256xf32>
    %24 = tpu.reciprocal %23 {approx = true} : vector<1x256xf32> -> vector<1x256xf32>
    %c0_17 = arith.constant 0 : index
    %c0_18 = arith.constant 0 : index
    %25 = vector.load %arg7[%c0_17, %c0_18] : memref<1x256xf32, #tpu.memory_space<vmem>>, vector<1x256xf32>
    tpu.vector_store %arg7[%c0_17, %c0_18], %24 {strides = array<i32>} : memref<1x256xf32, #tpu.memory_space<vmem>>, vector<1x256xf32>,
    return
  }
  func.func @transform_0(%arg0: i32) -> (i32, i32) {
    %c0_i32 = arith.constant 0 : i32
    %c0_i32_0 = arith.constant 0 : i32
    return %arg0, %c0_i32 : i32, i32
  }
  func.func @transform_1(%arg0: i32) -> (i32, i32) {
    %c0_i32 = arith.constant 0 : i32
    %c0_i32_0 = arith.constant 0 : i32
    %c0_i32_1 = arith.constant 0 : i32
    return %c0_i32, %c0_i32_0 : i32, i32
  }
  func.func @transform_2(%arg0: i32) -> (i32, i32) {
    %c0_i32 = arith.constant 0 : i32
    %c0_i32_0 = arith.constant 0 : i32
    %c0_i32_1 = arith.constant 0 : i32
    return %c0_i32, %c0_i32_0 : i32, i32
  }
  func.func @transform_3(%arg0: i32) -> (i32, i32) {
    %c0_i32 = arith.constant 0 : i32
    %c0_i32_0 = arith.constant 0 : i32
    %c0_i32_1 = arith.constant 0 : i32
    return %c0_i32, %c0_i32_0 : i32, i32
  }
  func.func @transform_4(%arg0: i32) -> (i32, i32) {
    %c0_i32 = arith.constant 0 : i32
    %c0_i32_0 = arith.constant 0 : i32
    %c0_i32_1 = arith.constant 0 : i32
    return %c0_i32, %c0_i32_0 : i32, i32
  }
  func.func @transform_5(%arg0: i32) -> (i32, i32) {
    %c0_i32 = arith.constant 0 : i32
    %c0_i32_0 = arith.constant 0 : i32
    %c0_i32_1 = arith.constant 0 : i32
    return %c0_i32, %c0_i32_0 : i32, i32
  }
  func.func @transform_6(%arg0: i32) -> (i32, i32) {
    %c0_i32 = arith.constant 0 : i32
    %c0_i32_0 = arith.constant 0 : i32
    return %c0_i32, %arg0 : i32, i32
  }
}

</mosaic_0001>

<bundles_post_ra>
// kernel: tpu_custom_call.1
= control target key start
LH: loop header
LB: loop body
LE: loop exit
PB: predicated region body
PF: predicated region fallthrough
CT: control target
= control target key end

     0   :  { %11 = vsyncpa [#allocation3], 0  ;;  %s1393_s0 = inlined_call_operand.hbm [shape: bf16[256,128], index: 0, kind: input, shape index: {}]   ;;  %s1394_s1 = inlined_call_operand.hbm [shape: bf16[128,128], index: 1, kind: input, shape index: {}]   ;;  %s1395_s2 = inlined_call_operand.vmem [shape: f32[1,128], index: 2, kind: input, shape index: {}]   ;;  %s1396_s3 = inlined_call_operand.hbm [shape: bf16[128,128], index: 3, kind: input, shape index: {}]   ;;  %s1397_s4 = inlined_call_operand.vmem [shape: f32[1,128], index: 4, kind: input, shape index: {}]   ;;  %s1398_s5 = inlined_call_operand.vmem [shape: bf16[1,128], index: 5, kind: input, shape index: {}]   ;;  %s1399_s6 = inlined_call_operand.hbm [shape: f32[1,256], index: 6, kind: output, shape index: {}]  }
   0x1   :  { %12 = vsyncpa [#allocation6], 0 }
   0x2   :  { %13 = vsyncpa [#allocation4], 0  ;;  %s1182_s21 = smov [#allocation5]   ;;  %s1183_s23 = smov [#allocation2]  }
   0x3   :  { %s31_s22 = sshll.u32 %s1182_s21, 4  ;;  %s19_s24 = sshll.u32 %s1183_s23, 4  ;;  %s32_s22 = int_to_ptr.vmem [resolvable:$true] %s31_s22  ;;  %s1224_s24 = int_to_ptr.vmem [resolvable:$true] %s19_s24 }
   0x4   :  { %s1088_s27 = scalar_lea.hbm %s1394_s1, 1024 }
   0x5   :  { %p1089_p0 = scmp.ne.s32.totalorder %s1394_s1, %s1088_s27  ;;  %p1092_p1 = scmp.lt.u32.totalorder %s1088_s27, %s1394_s1 }
   0x7   :  { %p1094_p2 = pnand %p1092_p1, %p1089_p0 }
   0x9   :  { %1097 = shalt.err (!%p1094_p2)
}
   0xa   :  { %s1098_s8 = scalar_lea.vmem %s32_s22, 1024  ;;  %p1103_p4 = scmp.lt.s32.totalorder %s32_s22, %s32_s22 }
   0xb   :  { %p1099_p3 = scmp.ne.s32.totalorder %s32_s22, %s1098_s8  ;;  %p1104_p5 = scmp.lt.s32.totalorder %s1098_s8, %s1098_s8 }
   0xd   :  { %p1105_p6 = por %p1104_p5, %p1103_p4 }
   0xf   :  { %p1106_p7 = pnand %p1105_p6, %p1099_p3 }
  0x11   :  { %1109 = shalt.err (!%p1106_p7)
}
  0x12   :  { %s1184_s9 = smov 64   ;;  %s1185_s10 = smov 4  }
  0x13   :  { %37 = dma.hbm_to_vmem [thread:$0]  %s1394_s1, 1024, %s32_s22, [#allocation6], %s1184_s9, %s1184_s9, %s1185_s10  }
  0x14   :  { %s1110_s15 = scalar_lea.hbm %s1393_s0, 2048 }
  0x15   :  { %p1111_p8 = scmp.ne.s32.totalorder %s1393_s0, %s1110_s15  ;;  %p1114_p9 = scmp.lt.u32.totalorder %s1110_s15, %s1393_s0 }
  0x17   :  { %p1116_p10 = pnand %p1114_p9, %p1111_p8 }
  0x19   :  { %1119 = shalt.err (!%p1116_p10)
}
  0x1a   :  { %s1120_s20 = scalar_lea.vmem %s1224_s24, 2048  ;;  %p1125_p12 = scmp.lt.s32.totalorder %s1224_s24, %s1224_s24 }
  0x1b   :  { %p1121_p11 = scmp.ne.s32.totalorder %s1224_s24, %s1120_s20  ;;  %p1126_p13 = scmp.lt.s32.totalorder %s1120_s20, %s1120_s20 }
  0x1d   :  { %p1127_p0 = por %p1126_p13, %p1125_p12 }
  0x1f   :  { %p1128_p1 = pnand %p1127_p0, %p1121_p11 }
  0x21   :  { %1131 = shalt.err (!%p1128_p1)
}
  0x22   :  { %25 = dma.hbm_to_vmem [thread:$0]  %s1393_s0, 2048, %s1224_s24, [#allocation3], %s1184_s9, %s1184_s9, %s1185_s10  }
  0x23   :  { %s1186_s22 = smov [#allocation7]   ;;  %s1132_s27 = scalar_lea.hbm %s1396_s3, 1024 }
  0x24   :  { %s45_s23 = sshll.u32 %s1186_s22, 4  ;;  %p1133_p2 = scmp.ne.s32.totalorder %s1396_s3, %s1132_s27  ;;  %s46_s23 = int_to_ptr.vmem [resolvable:$true] %s45_s23 }
  0x25   :  { %p1136_p3 = scmp.lt.u32.totalorder %s1132_s27, %s1396_s3 }
  0x27   :  { %p1138_p4 = pnand %p1136_p3, %p1133_p2 }
  0x29   :  { %1141 = shalt.err (!%p1138_p4)
}
  0x2a   :  { %s1142_s8 = scalar_lea.vmem %s46_s23, 1024  ;;  %p1147_p6 = scmp.lt.s32.totalorder %s46_s23, %s46_s23 }
  0x2b   :  { %p1143_p5 = scmp.ne.s32.totalorder %s46_s23, %s1142_s8  ;;  %p1148_p7 = scmp.lt.s32.totalorder %s1142_s8, %s1142_s8 }
  0x2d   :  { %p1149_p8 = por %p1148_p7, %p1147_p6 }
  0x2f   :  { %p1150_p9 = pnand %p1149_p8, %p1143_p5 }
  0x31   :  { %1153 = shalt.err (!%p1150_p9)
}
  0x32   :  { %51 = dma.hbm_to_vmem [thread:$0]  %s1396_s3, 1024, %s46_s23, [#allocation6], %s1184_s9, %s1184_s9, %s1185_s10  }
  0x33   :  { %1176 = dma.done.wait [#allocation3], 2048  }
  0x34   :  { %1177 = vsyncadd [#allocation3], 4294965248 }
  0x35   :  { %1178 = dma.done.wait [#allocation6], 2048  }
  0x36   :  { %1179 = vsyncadd [#allocation6], 4294965248  ;;  %v1048_v0 = vld [vmem:[#allocation5] sm:$0xff]   ;;  %v1049_v1 = vld [vmem:[#allocation5 + $0x8] sm:$0xff]  }
  0x37   :  { %945 = vmatprep.subr.bf16.mxu0 %v1048_v0  ;;  %v1050_v2 = vld [vmem:[#allocation5 + $0x10] sm:$0xff]   ;;  %v1051_v3 = vld [vmem:[#allocation5 + $0x18] sm:$0xff]   ;;  %v1056_v4 = vld [vmem:[#allocation2] sm:$0xff]  }
  0x38   :  { %946 = vmatpush3.bf16.msra.mxu0 %v1048_v0  ;;  %961 = vmatprep.mubr.bf16.mxu0 %v1056_v4  ;;  %v1052_v5 = vld [vmem:[#allocation5 + $0x20] sm:$0xff]   ;;  %v1053_v6 = vld [vmem:[#allocation5 + $0x28] sm:$0xff]   ;;  %v1054_v7 = vld [vmem:[#allocation5 + $0x30] sm:$0xff]  }
  0x39   :  { %947 = vmatprep.subr.bf16.mxu0 %v1049_v1  ;;  %v1055_v8 = vld [vmem:[#allocation5 + $0x38] sm:$0xff]   ;;  %v1072_v9 = vld [vmem:[#allocation7] sm:$0xff]   ;;  %v1073_v10 = vld [vmem:[#allocation7 + $0x8] sm:$0xff]  }
  0x3a   :  { %993 = vmatprep.subr.bf16.mxu1 %v1072_v9  ;;  %v1074_v11 = vld [vmem:[#allocation7 + $0x10] sm:$0xff]   ;;  %v1057_v12 = vld [vmem:[#allocation2 + $0x8] sm:$0xff]   ;;  %v1075_v14 = vld [vmem:[#allocation7 + $0x18] sm:$0xff]  }
  0x3b   :  { %994 = vmatpush3.bf16.msra.mxu1 %v1072_v9  ;;  %v1058_v13 = vld [vmem:[#allocation2 + $0x10] sm:$0xff]   ;;  %v1076_v15 = vld [vmem:[#allocation7 + $0x20] sm:$0xff]   ;;  %v1059_v16 = vld [vmem:[#allocation2 + $0x18] sm:$0xff]  }
  0x3c   :  { %948 = vmatpush3.bf16.msra.mxu0 %v1049_v1  ;;  %995 = vmatprep.subr.bf16.mxu1 %v1073_v10  ;;  %v1060_v17 = vld [vmem:[#allocation2 + $0x20] sm:$0xff]   ;;  %v1077_v18 = vld [vmem:[#allocation7 + $0x28] sm:$0xff]   ;;  %v1062_v20 = vld [vmem:[#allocation2 + $0x30] sm:$0xff]  }
  0x3d   :  { %949 = vmatprep.subr.bf16.mxu0 %v1050_v2  ;;  %v1061_v19 = vld [vmem:[#allocation2 + $0x28] sm:$0xff]   ;;  %v1063_v21 = vld [vmem:[#allocation2 + $0x38] sm:$0xff]   ;;  %v1064_v22 = vld [vmem:[#allocation2 + $0x40] sm:$0xff]  }
  0x3e   :  { %v1065_v23 = vld [vmem:[#allocation2 + $0x48] sm:$0xff]   ;;  %v1066_v24 = vld [vmem:[#allocation2 + $0x50] sm:$0xff]   ;;  %v1067_v25 = vld [vmem:[#allocation2 + $0x58] sm:$0xff]  }
  0x3f   :  { %996 = vmatpush3.bf16.msra.mxu1 %v1073_v10  ;;  %v1068_v26 = vld [vmem:[#allocation2 + $0x60] sm:$0xff]   ;;  %v1069_v27 = vld [vmem:[#allocation2 + $0x68] sm:$0xff]   ;;  %v1070_v28 = vld [vmem:[#allocation2 + $0x70] sm:$0xff]  }
  0x40   :  { %950 = vmatpush3.bf16.msra.mxu0 %v1050_v2  ;;  %997 = vmatprep.subr.bf16.mxu1 %v1074_v11  ;;  %v1071_v29 = vld [vmem:[#allocation2 + $0x78] sm:$0xff]   ;;  %v1078_v30 = vld [vmem:[#allocation7 + $0x30] sm:$0xff]   ;;  %v1279_v32 = vld [vmem:[%s1395_s2] ss:$0 sm:$0xff] }
  0x41   :  { %951 = vmatprep.subr.bf16.mxu0 %v1051_v3  ;;  %v1079_v31 = vld [vmem:[#allocation7 + $0x38] sm:$0xff]  }
  0x43   :  { %998 = vmatpush3.bf16.msra.mxu1 %v1074_v11 }
  0x44   :  { %952 = vmatpush3.bf16.msra.mxu0 %v1051_v3  ;;  %999 = vmatprep.subr.bf16.mxu1 %v1075_v14 }
  0x45   :  { %953 = vmatprep.subr.bf16.mxu0 %v1052_v5 }
  0x47   :  { %1000 = vmatpush3.bf16.msra.mxu1 %v1075_v14 }
  0x48   :  { %954 = vmatpush3.bf16.msra.mxu0 %v1052_v5  ;;  %1001 = vmatprep.subr.bf16.mxu1 %v1076_v15 }
  0x49   :  { %955 = vmatprep.subr.bf16.mxu0 %v1053_v6 }
  0x4b   :  { %1002 = vmatpush3.bf16.msra.mxu1 %v1076_v15 }
  0x4c   :  { %956 = vmatpush3.bf16.msra.mxu0 %v1053_v6  ;;  %1003 = vmatprep.subr.bf16.mxu1 %v1077_v18 }
  0x4d   :  { %957 = vmatprep.subr.bf16.mxu0 %v1054_v7 }
  0x4f   :  { %1004 = vmatpush3.bf16.msra.mxu1 %v1077_v18 }
  0x50   :  { %958 = vmatpush3.bf16.msra.mxu0 %v1054_v7  ;;  %1005 = vmatprep.subr.bf16.mxu1 %v1078_v30 }
  0x51   :  { %959 = vmatprep.subr.bf16.mxu0 %v1055_v8 }
  0x53   :  { %1006 = vmatpush3.bf16.msra.mxu1 %v1078_v30 }
  0x54   :  { %960 = vmatpush3.bf16.msra.mxu0 %v1055_v8  ;;  %1007 = vmatprep.subr.bf16.mxu1 %v1079_v31 }
  0x57   :  { %962 = vmatmul.mubr.bf16.vlgmr.msra.gmra.mrb[0].mxu0 %v1057_v12  ;;  %1008 = vmatpush3.bf16.msra.mxu1 %v1079_v31 }
  0x58   :  { %965 = vmatprep.mubr.bf16.mxu0 %v1058_v13 }
  0x5f   :  { %966 = vmatmul.mubr.bf16.gmra.mrb[4].mxu0 %v1059_v16 }
  0x60   :  { %969 = vmatprep.mubr.bf16.mxu0 %v1060_v17 }
  0x67   :  { %970 = vmatmul.mubr.bf16.gmra.mrb[8].mxu0 %v1061_v19 }
  0x68   :  { %973 = vmatprep.mubr.bf16.mxu0 %v1062_v20 }
  0x6f   :  { %974 = vmatmul.mubr.bf16.gmra.mrb[12].mxu0 %v1063_v21 }
  0x70   :  { %977 = vmatprep.mubr.bf16.mxu0 %v1064_v22 }
  0x77   :  { %978 = vmatmul.mubr.bf16.gmra.mrb[16].mxu0 %v1065_v23 }
  0x78   :  { %981 = vmatprep.mubr.bf16.mxu0 %v1066_v24 }
  0x7f   :  { %982 = vmatmul.mubr.bf16.gmra.mrb[20].mxu0 %v1067_v25 }
  0x80   :  { %985 = vmatprep.mubr.bf16.mxu0 %v1068_v26 }
  0x87   :  { %986 = vmatmul.mubr.bf16.gmra.mrb[24].mxu0 %v1069_v27 }
  0x88   :  { %989 = vmatprep.mubr.bf16.mxu0 %v1070_v28 }
  0x8f   :  { %990 = vmatmul.mubr.bf16.gmra.mrb[28].mxu0 %v1071_v29 }
 0x12a   :  { %v963_v33 = vpop.f32.mrb[0].mxu0 }
 0x12b   :  { %v308_v34 = vadd.f32 %v963_v33, %v1279_v32  ;;  %v299_v35 = vpop.f32.mrb[1].mxu0 }
 0x12c   :  { %v300_v36 = vadd.f32 %v1279_v32, %v299_v35  ;;  %v964_v37 = vpop.f32.mrb[2].mxu0 }
 0x12d   :  { %v311_v38 = vadd.f32 %v964_v37, %v1279_v32  ;;  %v302_v39 = vpop.f32.mrb[3].mxu0  ;;  %v428_v41 = vmax.f32 %v308_v34, 0.0 }
 0x12e   :  { %v303_v40 = vadd.f32 %v1279_v32, %v302_v39  ;;  %v426_v43 = vmax.f32 %v300_v36, 0.0 }
 0x12f   :  { %v429_v42 = vmax.f32 %v311_v38, 0.0 }
 0x130   :  { %v427_v44 = vmax.f32 %v303_v40, 0.0 }
 0x131   :  { %v459_v45 = vpack.c.bf16 %v429_v42, %v428_v41 }
 0x132   :  { %v967_v46 = vpop.f32.mrb[4].mxu0  ;;  %v458_v47 = vpack.c.bf16 %v427_v44, %v426_v43 }
 0x133   :  { %v324_v48 = vadd.f32 %v967_v46, %v1279_v32  ;;  %v315_v49 = vpop.f32.mrb[5].mxu0 }
 0x134   :  { %v316_v50 = vadd.f32 %v1279_v32, %v315_v49  ;;  %v968_v51 = vpop.f32.mrb[6].mxu0  ;;  %1009 = vmatprep.mubr.bf16.mxu1 %v458_v47 }
 0x135   :  { %v327_v52 = vadd.f32 %v968_v51, %v1279_v32  ;;  %v318_v53 = vpop.f32.mrb[7].mxu0  ;;  %1010 = vmatmul.mubr.bf16.vlgmr.msra.gmra.mrb[0].mxu1 %v459_v45  ;;  %v432_v55 = vmax.f32 %v324_v48, 0.0 }
 0x136   :  { %v319_v54 = vadd.f32 %v1279_v32, %v318_v53  ;;  %v430_v57 = vmax.f32 %v316_v50, 0.0 }
 0x137   :  { %v433_v56 = vmax.f32 %v327_v52, 0.0 }
 0x138   :  { %v431_v58 = vmax.f32 %v319_v54, 0.0 }
 0x139   :  { %v461_v59 = vpack.c.bf16 %v433_v56, %v432_v55 }
 0x13a   :  { %v460_v60 = vpack.c.bf16 %v431_v58, %v430_v57  ;;  %v971_v61 = vpop.f32.mrb[8].mxu0 }
 0x13b   :  { %v340_v62 = vadd.f32 %v971_v61, %v1279_v32  ;;  %v331_v63 = vpop.f32.mrb[9].mxu0 }
 0x13c   :  { %v332_v0 = vadd.f32 %v1279_v32, %v331_v63  ;;  %v972_v1 = vpop.f32.mrb[10].mxu0  ;;  %1013 = vmatprep.mubr.bf16.mxu1 %v460_v60 }
 0x13d   :  { %v343_v2 = vadd.f32 %v972_v1, %v1279_v32  ;;  %v334_v3 = vpop.f32.mrb[11].mxu0  ;;  %1014 = vmatmul.mubr.bf16.gmra.mrb[4].mxu1 %v461_v59  ;;  %v436_v5 = vmax.f32 %v340_v62, 0.0 }
 0x13e   :  { %v335_v4 = vadd.f32 %v1279_v32, %v334_v3  ;;  %v434_v7 = vmax.f32 %v332_v0, 0.0 }
 0x13f   :  { %v437_v6 = vmax.f32 %v343_v2, 0.0 }
 0x140   :  { %v435_v8 = vmax.f32 %v335_v4, 0.0 }
 0x141   :  { %v463_v9 = vpack.c.bf16 %v437_v6, %v436_v5 }
 0x142   :  { %v462_v10 = vpack.c.bf16 %v435_v8, %v434_v7  ;;  %v975_v11 = vpop.f32.mrb[12].mxu0 }
 0x143   :  { %v356_v12 = vadd.f32 %v975_v11, %v1279_v32  ;;  %v347_v13 = vpop.f32.mrb[13].mxu0 }
 0x144   :  { %v348_v14 = vadd.f32 %v1279_v32, %v347_v13  ;;  %v976_v15 = vpop.f32.mrb[14].mxu0  ;;  %1017 = vmatprep.mubr.bf16.mxu1 %v462_v10 }
 0x145   :  { %v359_v16 = vadd.f32 %v976_v15, %v1279_v32  ;;  %v350_v17 = vpop.f32.mrb[15].mxu0  ;;  %1018 = vmatmul.mubr.bf16.gmra.mrb[8].mxu1 %v463_v9  ;;  %v440_v19 = vmax.f32 %v356_v12, 0.0 }
 0x146   :  { %v351_v18 = vadd.f32 %v1279_v32, %v350_v17  ;;  %v438_v21 = vmax.f32 %v348_v14, 0.0 }
 0x147   :  { %v441_v20 = vmax.f32 %v359_v16, 0.0 }
 0x148   :  { %v439_v22 = vmax.f32 %v351_v18, 0.0  ;;  %v1316_v18 = vld [vmem:[%s1398_s5] sm:$0x1] }
 0x149   :  { %v465_v23 = vpack.c.bf16 %v441_v20, %v440_v19  ;;  %943 = vmatprep.mubr.bf16.mxu0 %v1316_v18  ;;  %v1322_v19 = vld [vmem:[%s1397_s4] ss:$0 sm:$0xff]  ;;  %s1188_s4 = smov [#allocation8]  }
 0x14a   :  { %v464_v24 = vpack.c.bf16 %v439_v22, %v438_v21  ;;  %v979_v25 = vpop.f32.mrb[16].mxu0  ;;  %s835_s5 = sshll.u32 %s1188_s4, 4  ;;  %s836_s5 = int_to_ptr.vmem [resolvable:$true] %s835_s5 }
 0x14b   :  { %v372_v26 = vadd.f32 %v979_v25, %v1279_v32  ;;  %v363_v27 = vpop.f32.mrb[17].mxu0  ;;  %s1154_s13 = scalar_lea.vmem %s836_s5, 32  ;;  %p1159_p11 = scmp.lt.s32.totalorder %s836_s5, %s836_s5 }
 0x14c   :  { %v364_v28 = vadd.f32 %v1279_v32, %v363_v27  ;;  %v980_v29 = vpop.f32.mrb[18].mxu0  ;;  %1021 = vmatprep.mubr.bf16.mxu1 %v464_v24  ;;  %p1155_p10 = scmp.ne.s32.totalorder %s836_s5, %s1154_s13  ;;  %p1160_p12 = scmp.lt.s32.totalorder %s1154_s13, %s1154_s13 }
 0x14d   :  { %v375_v30 = vadd.f32 %v980_v29, %v1279_v32  ;;  %v366_v31 = vpop.f32.mrb[19].mxu0  ;;  %1022 = vmatmul.mubr.bf16.gmra.mrb[12].mxu1 %v465_v23  ;;  %v444_v34 = vmax.f32 %v372_v26, 0.0 }
 0x14e   :  { %v367_v33 = vadd.f32 %v1279_v32, %v366_v31  ;;  %v442_v36 = vmax.f32 %v364_v28, 0.0  ;;  %p1161_p13 = por %p1160_p12, %p1159_p11 }
 0x14f   :  { %v445_v35 = vmax.f32 %v375_v30, 0.0 }
 0x150   :  { %v443_v37 = vmax.f32 %v367_v33, 0.0  ;;  %p1162_p0 = pnand %p1161_p13, %p1155_p10 }
 0x151   :  { %v467_v38 = vpack.c.bf16 %v445_v35, %v444_v34 }
 0x152   :  { %v466_v39 = vpack.c.bf16 %v443_v37, %v442_v36  ;;  %v983_v40 = vpop.f32.mrb[20].mxu0 }
 0x153   :  { %v388_v41 = vadd.f32 %v983_v40, %v1279_v32  ;;  %v379_v42 = vpop.f32.mrb[21].mxu0 }
 0x154   :  { %v380_v43 = vadd.f32 %v1279_v32, %v379_v42  ;;  %1025 = vmatprep.mubr.bf16.mxu1 %v466_v39  ;;  %v984_v44 = vpop.f32.mrb[22].mxu0 }
 0x155   :  { %v448_v45 = vmax.f32 %v388_v41, 0.0  ;;  %v391_v46 = vadd.f32 %v984_v44, %v1279_v32  ;;  %1026 = vmatmul.mubr.bf16.gmra.mrb[16].mxu1 %v467_v38  ;;  %v382_v47 = vpop.f32.mrb[23].mxu0 }
 0x156   :  { %v446_v48 = vmax.f32 %v380_v43, 0.0  ;;  %v383_v49 = vadd.f32 %v1279_v32, %v382_v47 }
 0x157   :  { %v449_v50 = vmax.f32 %v391_v46, 0.0 }
 0x158   :  { %v447_v51 = vmax.f32 %v383_v49, 0.0 }
 0x159   :  { %v469_v52 = vpack.c.bf16 %v449_v50, %v448_v45 }
 0x15a   :  { %v468_v53 = vpack.c.bf16 %v447_v51, %v446_v48  ;;  %v987_v54 = vpop.f32.mrb[24].mxu0 }
 0x15b   :  { %v404_v55 = vadd.f32 %v987_v54, %v1279_v32  ;;  %v395_v56 = vpop.f32.mrb[25].mxu0 }
 0x15c   :  { %1029 = vmatprep.mubr.bf16.mxu1 %v468_v53  ;;  %v396_v57 = vadd.f32 %v1279_v32, %v395_v56  ;;  %v988_v58 = vpop.f32.mrb[26].mxu0 }
 0x15d   :  { %1030 = vmatmul.mubr.bf16.gmra.mrb[20].mxu1 %v469_v52  ;;  %v452_v59 = vmax.f32 %v404_v55, 0.0  ;;  %v407_v60 = vadd.f32 %v988_v58, %v1279_v32  ;;  %v398_v61 = vpop.f32.mrb[27].mxu0 }
 0x15e   :  { %v450_v62 = vmax.f32 %v396_v57, 0.0  ;;  %v399_v63 = vadd.f32 %v1279_v32, %v398_v61 }
 0x15f   :  { %v453_v0 = vmax.f32 %v407_v60, 0.0 }
 0x160   :  { %v451_v1 = vmax.f32 %v399_v63, 0.0 }
 0x161   :  { %v471_v2 = vpack.c.bf16 %v453_v0, %v452_v59 }
 0x162   :  { %v470_v3 = vpack.c.bf16 %v451_v1, %v450_v62  ;;  %v991_v4 = vpop.f32.mrb[28].mxu0 }
 0x163   :  { %v420_v5 = vadd.f32 %v991_v4, %v1279_v32  ;;  %v411_v6 = vpop.f32.mrb[29].mxu0 }
 0x164   :  { %1033 = vmatprep.mubr.bf16.mxu1 %v470_v3  ;;  %v412_v7 = vadd.f32 %v1279_v32, %v411_v6  ;;  %v992_v8 = vpop.f32.mrb[30].mxu0 }
 0x165   :  { %1034 = vmatmul.mubr.bf16.gmra.mrb[24].mxu1 %v471_v2  ;;  %v456_v9 = vmax.f32 %v420_v5, 0.0  ;;  %v423_v10 = vadd.f32 %v992_v8, %v1279_v32  ;;  %v414_v11 = vpop.f32.mrb[31].mxu0 }
 0x166   :  { %v454_v12 = vmax.f32 %v412_v7, 0.0  ;;  %v415_v13 = vadd.f32 %v1279_v32, %v414_v11 }
 0x167   :  { %v457_v14 = vmax.f32 %v423_v10, 0.0 }
 0x168   :  { %v455_v15 = vmax.f32 %v415_v13, 0.0 }
 0x169   :  { %v473_v16 = vpack.c.bf16 %v457_v14, %v456_v9 }
 0x16a   :  { %v472_v17 = vpack.c.bf16 %v455_v15, %v454_v12 }
 0x16c   :  { %1037 = vmatprep.mubr.bf16.mxu1 %v472_v17 }
 0x16d   :  { %1038 = vmatmul.mubr.bf16.gmra.mrb[28].mxu1 %v473_v16 }
 0x208   :  { %v1011_v20 = vpop.f32.mrb[0].mxu1 }
 0x209   :  { %v588_v32 = vadd.f32 %v1011_v20, %v1322_v19  ;;  %v579_v21 = vpop.f32.mrb[1].mxu1 }
 0x20a   :  { %v580_v22 = vadd.f32 %v1322_v19, %v579_v21  ;;  %v1012_v23 = vpop.f32.mrb[2].mxu1 }
 0x20b   :  { %v591_v24 = vadd.f32 %v1012_v23, %v1322_v19  ;;  %v582_v25 = vpop.f32.mrb[3].mxu1  ;;  %v708_v27 = vmax.f32 %v588_v32, 0.0 }
 0x20c   :  { %v583_v26 = vadd.f32 %v1322_v19, %v582_v25  ;;  %v706_v29 = vmax.f32 %v580_v22, 0.0 }
 0x20d   :  { %v709_v28 = vmax.f32 %v591_v24, 0.0 }
 0x20e   :  { %v707_v30 = vmax.f32 %v583_v26, 0.0 }
 0x20f   :  { %v1328_v31 = vpack.c.bf16 %v709_v28, %v708_v27 }
 0x210   :  { %v1330_v33 = vpack.c.bf16 %v707_v30, %v706_v29  ;;  %v1015_v34 = vpop.f32.mrb[4].mxu1 }
 0x211   :  { %v604_v35 = vadd.f32 %v1015_v34, %v1322_v19  ;;  %v595_v36 = vpop.f32.mrb[5].mxu1 }
 0x212   :  { %v596_v37 = vadd.f32 %v1322_v19, %v595_v36  ;;  %v1016_v38 = vpop.f32.mrb[6].mxu1 }
 0x213   :  { %v607_v39 = vadd.f32 %v1016_v38, %v1322_v19  ;;  %v598_v40 = vpop.f32.mrb[7].mxu1  ;;  %v712_v42 = vmax.f32 %v604_v35, 0.0 }
 0x214   :  { %v599_v41 = vadd.f32 %v1322_v19, %v598_v40  ;;  %v710_v44 = vmax.f32 %v596_v37, 0.0 }
 0x215   :  { %v713_v43 = vmax.f32 %v607_v39, 0.0 }
 0x216   :  { %v711_v45 = vmax.f32 %v599_v41, 0.0 }
 0x217   :  { %v1336_v46 = vpack.c.bf16 %v713_v43, %v712_v42 }
 0x218   :  { %v1338_v47 = vpack.c.bf16 %v711_v45, %v710_v44  ;;  %v1019_v48 = vpop.f32.mrb[8].mxu1 }
 0x219   :  { %v620_v49 = vadd.f32 %v1019_v48, %v1322_v19  ;;  %v611_v50 = vpop.f32.mrb[9].mxu1 }
 0x21a   :  { %v612_v51 = vadd.f32 %v1322_v19, %v611_v50  ;;  %v1020_v52 = vpop.f32.mrb[10].mxu1 }
 0x21b   :  { %v623_v53 = vadd.f32 %v1020_v52, %v1322_v19  ;;  %v614_v54 = vpop.f32.mrb[11].mxu1  ;;  %v716_v56 = vmax.f32 %v620_v49, 0.0 }
 0x21c   :  { %v615_v55 = vadd.f32 %v1322_v19, %v614_v54  ;;  %v714_v58 = vmax.f32 %v612_v51, 0.0 }
 0x21d   :  { %v717_v57 = vmax.f32 %v623_v53, 0.0 }
 0x21e   :  { %v715_v59 = vmax.f32 %v615_v55, 0.0 }
 0x21f   :  { %v1344_v60 = vpack.c.bf16 %v717_v57, %v716_v56 }
 0x220   :  { %v1346_v61 = vpack.c.bf16 %v715_v59, %v714_v58  ;;  %v1023_v62 = vpop.f32.mrb[12].mxu1 }
 0x221   :  { %v636_v63 = vadd.f32 %v1023_v62, %v1322_v19  ;;  %v627_v0 = vpop.f32.mrb[13].mxu1 }
 0x222   :  { %v628_v1 = vadd.f32 %v1322_v19, %v627_v0  ;;  %v1024_v2 = vpop.f32.mrb[14].mxu1 }
 0x223   :  { %v639_v3 = vadd.f32 %v1024_v2, %v1322_v19  ;;  %v630_v4 = vpop.f32.mrb[15].mxu1  ;;  %v720_v6 = vmax.f32 %v636_v63, 0.0 }
 0x224   :  { %v631_v5 = vadd.f32 %v1322_v19, %v630_v4  ;;  %v718_v8 = vmax.f32 %v628_v1, 0.0 }
 0x225   :  { %v721_v7 = vmax.f32 %v639_v3, 0.0 }
 0x226   :  { %v719_v9 = vmax.f32 %v631_v5, 0.0 }
 0x227   :  { %v1352_v10 = vpack.c.bf16 %v721_v7, %v720_v6 }
 0x228   :  { %v1354_v11 = vpack.c.bf16 %v719_v9, %v718_v8  ;;  %v1027_v12 = vpop.f32.mrb[16].mxu1 }
 0x229   :  { %v652_v13 = vadd.f32 %v1027_v12, %v1322_v19  ;;  %v643_v14 = vpop.f32.mrb[17].mxu1 }
 0x22a   :  { %v644_v15 = vadd.f32 %v1322_v19, %v643_v14  ;;  %v1028_v16 = vpop.f32.mrb[18].mxu1 }
 0x22b   :  { %v655_v17 = vadd.f32 %v1028_v16, %v1322_v19  ;;  %v646_v20 = vpop.f32.mrb[19].mxu1  ;;  %v724_v21 = vmax.f32 %v652_v13, 0.0 }
 0x22c   :  { %v647_v32 = vadd.f32 %v1322_v19, %v646_v20  ;;  %v722_v23 = vmax.f32 %v644_v15, 0.0 }
 0x22d   :  { %v725_v22 = vmax.f32 %v655_v17, 0.0 }
 0x22e   :  { %v723_v24 = vmax.f32 %v647_v32, 0.0  ;;  %v812_v32 = vlaneseq }
 0x22f   :  { %v747_v25 = vpack.c.bf16 %v725_v22, %v724_v21 }
 0x230   :  { %v746_v26 = vpack.c.bf16 %v723_v24, %v722_v23  ;;  %v1031_v27 = vpop.f32.mrb[20].mxu1  ;;  %v813_v21 = vshrl.u32 %v812_v32, 7  ;;  %vm826_vm0 = vcmp.lt.s32.totalorder %v812_v32, 256 }
 0x231   :  { %v668_v28 = vadd.f32 %v1031_v27, %v1322_v19  ;;  %v659_v29 = vpop.f32.mrb[21].mxu1 }
 0x232   :  { %v660_v30 = vadd.f32 %v1322_v19, %v659_v29  ;;  %927 = vmatprep.subr.bf16.mxu0 %v746_v26  ;;  %v1032_v34 = vpop.f32.mrb[22].mxu1 }
 0x233   :  { %v728_v35 = vmax.f32 %v668_v28, 0.0  ;;  %v671_v36 = vadd.f32 %v1032_v34, %v1322_v19  ;;  %928 = vmatpush3.bf16.xpose.msra.mxu0 %v1330_v33  ;;  %v662_v37 = vpop.f32.mrb[23].mxu1 }
 0x234   :  { %v726_v38 = vmax.f32 %v660_v30, 0.0  ;;  %v663_v39 = vadd.f32 %v1322_v19, %v662_v37  ;;  %929 = vmatprep.subr.bf16.mxu0 %v747_v25 }
 0x235   :  { %v729_v40 = vmax.f32 %v671_v36, 0.0 }
 0x236   :  { %v727_v41 = vmax.f32 %v663_v39, 0.0 }
 0x237   :  { %v749_v42 = vpack.c.bf16 %v729_v40, %v728_v35 }
 0x238   :  { %v748_v43 = vpack.c.bf16 %v727_v41, %v726_v38  ;;  %v1035_v44 = vpop.f32.mrb[24].mxu1 }
 0x239   :  { %v684_v45 = vadd.f32 %v1035_v44, %v1322_v19  ;;  %v675_v48 = vpop.f32.mrb[25].mxu1 }
 0x23a   :  { %v676_v49 = vadd.f32 %v1322_v19, %v675_v48  ;;  %v1036_v50 = vpop.f32.mrb[26].mxu1 }
 0x23b   :  { %930 = vmatpush3.bf16.xpose.msra.mxu0 %v1328_v31  ;;  %v732_v51 = vmax.f32 %v684_v45, 0.0  ;;  %v687_v33 = vadd.f32 %v1036_v50, %v1322_v19  ;;  %v678_v52 = vpop.f32.mrb[27].mxu1 }
 0x23c   :  { %931 = vmatprep.subr.bf16.mxu0 %v748_v43  ;;  %v730_v53 = vmax.f32 %v676_v49, 0.0  ;;  %v679_v54 = vadd.f32 %v1322_v19, %v678_v52 }
 0x23d   :  { %v733_v55 = vmax.f32 %v687_v33, 0.0 }
 0x23e   :  { %v731_v56 = vmax.f32 %v679_v54, 0.0 }
 0x23f   :  { %v751_v57 = vpack.c.bf16 %v733_v55, %v732_v51 }
 0x240   :  { %v750_v58 = vpack.c.bf16 %v731_v56, %v730_v53  ;;  %v1039_v59 = vpop.f32.mrb[28].mxu1 }
 0x241   :  { %v700_v62 = vadd.f32 %v1039_v59, %v1322_v19  ;;  %v691_v63 = vpop.f32.mrb[29].mxu1 }
 0x242   :  { %v692_v0 = vadd.f32 %v1322_v19, %v691_v63  ;;  %v1040_v1 = vpop.f32.mrb[30].mxu1 }
 0x243   :  { %932 = vmatpush3.bf16.xpose.msra.mxu0 %v1338_v47  ;;  %v736_v31 = vmax.f32 %v700_v62, 0.0  ;;  %v703_v2 = vadd.f32 %v1040_v1, %v1322_v19  ;;  %v694_v3 = vpop.f32.mrb[31].mxu1 }
 0x244   :  { %933 = vmatprep.subr.bf16.mxu0 %v749_v42  ;;  %v734_v4 = vmax.f32 %v692_v0, 0.0  ;;  %v695_v5 = vadd.f32 %v1322_v19, %v694_v3 }
 0x245   :  { %v737_v6 = vmax.f32 %v703_v2, 0.0 }
 0x246   :  { %v735_v7 = vmax.f32 %v695_v5, 0.0 }
 0x247   :  { %v753_v8 = vpack.c.bf16 %v737_v6, %v736_v31 }
 0x248   :  { %v752_v9 = vpack.c.bf16 %v735_v7, %v734_v4 }
 0x24b   :  { %934 = vmatpush3.bf16.xpose.msra.mxu0 %v1336_v46 }
 0x24c   :  { %935 = vmatprep.subr.bf16.mxu0 %v750_v58 }
 0x253   :  { %936 = vmatpush3.bf16.xpose.msra.mxu0 %v1346_v61 }
 0x254   :  { %937 = vmatprep.subr.bf16.mxu0 %v751_v57 }
 0x25b   :  { %938 = vmatpush3.bf16.xpose.msra.mxu0 %v1344_v60 }
 0x25c   :  { %939 = vmatprep.subr.bf16.mxu0 %v752_v9 }
 0x263   :  { %940 = vmatpush3.bf16.xpose.msra.mxu0 %v1354_v11  ;;  %v1187_v11 = vmov 1966171168  }
 0x264   :  { %941 = vmatprep.subr.bf16.mxu0 %v753_v8 }
 0x26b   :  { %942 = vmatpush3.bf16.xpose.msra.mxu0 %v1352_v10  ;;  %v810_v10 = vunpack.c.l.s4 %v1187_v11 }
 0x272   :  { %944 = vmatmul.mubr.bf16.vlgmr.msra.gmra.mrb[32].mxu0 %v1316_v18  ;;  %v811_v18 = vunpack.c.0.s8 %v810_v10 }
 0x274   :  { %v814_v23 = vsub.s32 %v811_v18, %v813_v21 }
 0x345   :  { %v789_v19 = vpop.f32.mrb[32].mxu0 }
 0x346   :  { %v796_v47 = vsub.f32 0.0, %v789_v19  ;;  %v791_v12 = vpop.f32.mrb[33].mxu0 }
 0x347   :  { %v797_v13 = vsub.f32 0.0, %v791_v12  ;;  %v793_v14 = vpop.f32.mrb[34].mxu0 }
 0x348   :  { %v798_v46 = vmul.f32 1.442695, %v796_v47  ;;  %v794_v15 = vpop.f32.mrb[35].mxu0 }
 0x349   :  { %v800_v16 = vmul.f32 1.442695, %v797_v13 }
 0x34a   :  { %1080 = vpow2.f32 %v798_v46 }
 0x34b   :  { %1082 = vpow2.f32 %v800_v16 }
 0x354   :  { %v1081_v61 = vpop.eup %1080 }
 0x355   :  { %v1083_v60 = vpop.eup %1082  ;;  %v802_v17 = vadd.f32 1.0, %v1081_v61 }
 0x356   :  { %v803_v20 = vadd.f32 1.0, %v1083_v60 }
 0x357   :  { %1084 = vrcp.f32 %v802_v17 }
 0x358   :  { %1086 = vrcp.f32 %v803_v20 }
 0x361   :  { %v1085_v22 = vpop.eup %1084 }
 0x362   :  { %v1087_v24 = vpop.eup %1086 }
 0x363   :  { %v808_v25 = vcombine.low %v1085_v22, %v1087_v24 }
 0x365   :  { %v815_v26 = vrot.slane %v808_v25, %v814_v23 }
 0x367   :  { %v822_v27 = vrot.slane %v815_v26, %v814_v23 }
 0x369   :  { %828 = vst.msk [vmem:[#allocation8] sm:$0x3] %vm826_vm0, %v822_v27 }
 0x36a   :  { %1165 = shalt.err (!%p1162_p0)
}
 0x36b   :  { %s1166_s16 = scalar_lea.hbm %s1399_s6, 32 }
 0x36c   :  { %p1167_p1 = scmp.ne.s32.totalorder %s1399_s6, %s1166_s16  ;;  %p1170_p2 = scmp.lt.u32.totalorder %s1166_s16, %s1399_s6 }
 0x36e   :  { %p1172_p3 = pnand %p1170_p2, %p1167_p1 }
 0x370   :  { %1175 = shalt.err (!%p1172_p3)
}
 0x371   :  { %838 = dma.vmem_to_hbm [thread:$0]  %s836_s5, 32, %s1399_s6, [#allocation4]  }
 0x372   :  { %1180 = dma.done.wait [#allocation4], 32  }
 0x373   :  { %1181 = vsyncadd [#allocation4], 4294967264 }
 0x374   :  { %842 = vsyncpa [#allocation3], 1 }
 0x375   :  { %843 = vsyncpa [#allocation6], 1 }
 0x376   :  { %844 = vsyncpa [#allocation4], 1 }

</bundles_post_ra>
